<compile_context>
chip_gen: v7x
topology: tpu7x:2x2x1
jax: 0.10.0
libtpu: 0.0.40
codegen_flags: <defaults>
</compile_context>

<pallas_src>
import jax
import jax.numpy as jnp
from jax.experimental import pallas as pl
from jax.experimental.pallas import tpu as pltpu


def _round_up(x, m):
    return (x + m - 1) // m * m


def _ncf_mlp_kernel(ue_ref, ie_ref, w1u_ref, w1i_ref, w2_ref, w3_ref, wo_ref,
                    b1_ref, b2_ref, b3_ref, bo_ref, out_ref):
    """One batch tile of the fused NCF MLP, computed as W @ X (features, batch).

    ue_ref / ie_ref : (E, TB)   bf16  gathered user / item embeddings (streamed)
    w1u/w1i         : (64, E)   bf16  fc1 weight halves (VMEM-resident)
    w2 / w3 / wo    : (32,64) / (16,32) / (1,16) bf16 (VMEM-resident)
    b1/b2/b3/bo     : (N, 1)    f32   column biases (VMEM-resident)
    out_ref         : (1, TB)   f32   lane-dense prediction row
    """
    xu = ue_ref[...]                       # (E, TB)
    xi = ie_ref[...]

    # fc1 on concat([ue, ie]) computed as two half-K matmuls so the (2E, B)
    # concatenated tensor never exists anywhere.
    h1 = (jnp.dot(w1u_ref[...], xu, preferred_element_type=jnp.float32)
          + jnp.dot(w1i_ref[...], xi, preferred_element_type=jnp.float32))
    h1 = jnp.maximum(h1 + b1_ref[...], 0.0).astype(jnp.bfloat16)      # (64, TB)

    h2 = jnp.dot(w2_ref[...], h1, preferred_element_type=jnp.float32) + b2_ref[...]
    h2 = jnp.maximum(h2, 0.0).astype(jnp.bfloat16)                    # (32, TB)

    h3 = jnp.dot(w3_ref[...], h2, preferred_element_type=jnp.float32) + b3_ref[...]
    h3 = jnp.maximum(h3, 0.0).astype(jnp.bfloat16)                    # (16, TB)

    pred = jnp.dot(wo_ref[...], h3, preferred_element_type=jnp.float32) + bo_ref[...]
    out_ref[...] = pred.astype(out_ref.dtype)                         # (1, TB)


def ncf_forward(params, user_input, item_input, *, tile_b=1024):
    """Reproduces NCF.forward(user_input, item_input) -> (B, 1) float32."""
    E = params["user_embedding"].shape[1]

    # TODO(synk): the embedding row gather stays in XLA (jnp.take); an in-kernel
    # gather would need one tiny DMA per row (descriptor overhead > bytes moved).
    # The transpose to (E, B) is layout plumbing for the lane-dense kernel.
    ue = jnp.take(params["user_embedding"].astype(jnp.bfloat16), user_input, axis=0).T
    ie = jnp.take(params["item_embedding"].astype(jnp.bfloat16), item_input, axis=0).T

    B = ue.shape[1]
    # Batch tile sits on the lane axis -> multiple of 128.
    tb = min(_round_up(tile_b, 128), _round_up(B, 128))
    b_pad = _round_up(B, tb)
    if b_pad != B:
        ue = jnp.pad(ue, ((0, 0), (0, b_pad - B)))
        ie = jnp.pad(ie, ((0, 0), (0, b_pad - B)))

    w1 = params["w1"].astype(jnp.bfloat16)
    w1u_t = w1[:E, :].T                                   # (64, E)
    w1i_t = w1[E:, :].T                                   # (64, E)
    w2_t = params["w2"].astype(jnp.bfloat16).T            # (32, 64)
    w3_t = params["w3"].astype(jnp.bfloat16).T            # (16, 32)
    wo_t = params["wo"].astype(jnp.bfloat16).T            # (1, 16)

    b1 = params["b1"].reshape(-1, 1).astype(jnp.float32)  # (64, 1)
    b2 = params["b2"].reshape(-1, 1).astype(jnp.float32)  # (32, 1)
    b3 = params["b3"].reshape(-1, 1).astype(jnp.float32)  # (16, 1)
    bo = params["bo"].reshape(-1, 1).astype(jnp.float32)  # (1, 1)

    grid = (pl.cdiv(b_pad, tb),)
    stream_spec = lambda: pl.BlockSpec((E, tb), lambda i: (0, i))      # streamed
    res_spec = lambda a: pl.BlockSpec(a.shape, lambda i: (0, 0))       # resident

    out = pl.pallas_call(
        _ncf_mlp_kernel,
        out_shape=jax.ShapeDtypeStruct((1, b_pad), jnp.float32),
        grid=grid,
        in_specs=[
            stream_spec(), stream_spec(),
            res_spec(w1u_t), res_spec(w1i_t),
            res_spec(w2_t), res_spec(w3_t), res_spec(wo_t),
            res_spec(b1), res_spec(b2), res_spec(b3), res_spec(bo),
        ],
        out_specs=pl.BlockSpec((1, tb), lambda i: (0, i)),
        compiler_params=pltpu.CompilerParams(
            dimension_semantics=("parallel",)),   # batch tiles shard across TCs
    )(ue, ie, w1u_t, w1i_t, w2_t, w3_t, wo_t, b1, b2, b3, bo)

    return out[0, :B].reshape(B, 1)


def init_params(key, num_users, num_items, embedding_size=32):
    """Deterministic synthetic parameters matching NCF.__init__ shapes.
    Linear weights stored as (in_features, out_features)."""
    ks = jax.random.split(key, 10)

    def linear(kw, kb, fan_in, fan_out):
        bound = 1.0 / jnp.sqrt(fan_in)
        w = jax.random.uniform(kw, (fan_in, fan_out), jnp.float32, -bound, bound)
        b = jax.random.uniform(kb, (1, fan_out), jnp.float32, -bound, bound)
        return w, b

    w1, b1 = linear(ks[2], ks[3], embedding_size * 2, 64)
    w2, b2 = linear(ks[4], ks[5], 64, 32)
    w3, b3 = linear(ks[6], ks[7], 32, 16)
    wo, bo = linear(ks[8], ks[9], 16, 1)

    return {
        "user_embedding": jax.random.normal(ks[0], (num_users, embedding_size), jnp.float32),
        "item_embedding": jax.random.normal(ks[1], (num_items, embedding_size), jnp.float32),
        "w1": w1, "b1": b1,
        "w2": w2, "b2": b2,
        "w3": w3, "b3": b3,
        "wo": wo, "bo": bo,
    }


def _reference_bf16(params, user_input, item_input):
    """Pure-JAX reference mirroring the kernel math exactly (bf16 storage, f32 acc,
    transposed (features, batch) orientation)."""
    E = params["user_embedding"].shape[1]
    ue = jnp.take(params["user_embedding"].astype(jnp.bfloat16), user_input, axis=0).T
    ie = jnp.take(params["item_embedding"].astype(jnp.bfloat16), item_input, axis=0).T
    w1 = params["w1"].astype(jnp.bfloat16)
    h1 = (jnp.dot(w1[:E, :].T, ue, preferred_element_type=jnp.float32)
          + jnp.dot(w1[E:, :].T, ie, preferred_element_type=jnp.float32))
    h1 = jnp.maximum(h1 + params["b1"].reshape(-1, 1), 0.0).astype(jnp.bfloat16)
    h2 = jnp.dot(params["w2"].astype(jnp.bfloat16).T, h1,
                 preferred_element_type=jnp.float32) + params["b2"].reshape(-1, 1)
    h2 = jnp.maximum(h2, 0.0).astype(jnp.bfloat16)
    h3 = jnp.dot(params["w3"].astype(jnp.bfloat16).T, h2,
                 preferred_element_type=jnp.float32) + params["b3"].reshape(-1, 1)
    h3 = jnp.maximum(h3, 0.0).astype(jnp.bfloat16)
    pred = jnp.dot(params["wo"].astype(jnp.bfloat16).T, h3,
                   preferred_element_type=jnp.float32) + params["bo"].reshape(-1, 1)
    return pred.T


def _reference_f32(params, user_input, item_input):
    """Full-precision reference matching the original PyTorch module semantics."""
    ue = jnp.take(params["user_embedding"], user_input, axis=0)
    ie = jnp.take(params["item_embedding"], item_input, axis=0)
    v = jnp.concatenate([ue, ie], axis=-1)
    x = jnp.maximum(v @ params["w1"] + params["b1"], 0.0)
    x = jnp.maximum(x @ params["w2"] + params["b2"], 0.0)
    x = jnp.maximum(x @ params["w3"] + params["b3"], 0.0)
    return x @ params["wo"] + params["bo"]


if __name__ == "__main__":
    key = jax.random.PRNGKey(0)
    num_users, num_items, embedding_size = 50, 40, 32

    pkey, ukey, ikey = jax.random.split(key, 3)
    params = init_params(pkey, num_users, num_items, embedding_size)

    # --- small batch (single grid tile, batch 8 padded to one 128-lane tile) ---
    u1 = jax.random.randint(ukey, (8,), 0, num_users, dtype=jnp.int32)
    i1 = jax.random.randint(ikey, (8,), 0, num_items, dtype=jnp.int32)
    p1 = ncf_forward(params, u1, i1)
    jax.block_until_ready(p1)
    r1 = _reference_bf16(params, u1, i1)
    assert p1.shape == (8, 1), p1.shape
    assert jnp.allclose(p1, r1, atol=2e-3, rtol=2e-3), (p1, r1)

    # --- multi-tile grid (batch 300, tile 128 -> grid (3,), padded to 384) ---
    u2 = jax.random.randint(jax.random.PRNGKey(1), (300,), 0, num_users, dtype=jnp.int32)
    i2 = jax.random.randint(jax.random.PRNGKey(2), (300,), 0, num_items, dtype=jnp.int32)
    p2 = ncf_forward(params, u2, i2, tile_b=128)
    jax.block_until_ready(p2)
    r2 = _reference_bf16(params, u2, i2)
    assert p2.shape == (300, 1), p2.shape
    assert jnp.allclose(p2, r2, atol=2e-3, rtol=2e-3), (p2, r2)

    # Loose sanity check against the full-f32 module semantics (bf16 storage
    # introduces only ~1-2% relative error for this MLP).
    f32_ref = _reference_f32(params, u2, i2)
    assert float(jnp.max(jnp.abs(p2 - f32_ref))) < 0.1

    print("KERNEL_OK")
</pallas_src>

<mosaic_0001>
module attributes {stable_mosaic.version = 11 : i64} {
  func.func @_ncf_mlp_kernel(%arg0: i32, %arg1: memref<32x128xbf16, #tpu.memory_space<vmem>>, %arg2: memref<32x128xbf16, #tpu.memory_space<vmem>>, %arg3: memref<64x32xbf16, #tpu.memory_space<vmem>>, %arg4: memref<64x32xbf16, #tpu.memory_space<vmem>>, %arg5: memref<32x64xbf16, #tpu.memory_space<vmem>>, %arg6: memref<16x32xbf16, #tpu.memory_space<vmem>>, %arg7: memref<1x16xbf16, #tpu.memory_space<vmem>>, %arg8: memref<64x1xf32, #tpu.memory_space<vmem>>, %arg9: memref<32x1xf32, #tpu.memory_space<vmem>>, %arg10: memref<16x1xf32, #tpu.memory_space<vmem>>, %arg11: memref<1x1xf32, #tpu.memory_space<vmem>>, %arg12: memref<1x128xf32, #tpu.memory_space<vmem>>) attributes {dimension_semantics = [#tpu.dimension_semantics<parallel>], iteration_bounds = array<i64: 1>, scalar_prefetch = 0 : i64, scratch_operands = 0 : i64, tpu.core_type = #tpu.core_type<tc>, window_params = [{transform_indices = @transform_0, window_bounds = array<i64: 32, 128>}, {transform_indices = @transform_1, window_bounds = array<i64: 32, 128>}, {pipeline_mode = #tpu.pipeline_mode<synchronous>, transform_indices = @transform_2, window_bounds = array<i64: 64, 32>}, {pipeline_mode = #tpu.pipeline_mode<synchronous>, transform_indices = @transform_3, window_bounds = array<i64: 64, 32>}, {pipeline_mode = #tpu.pipeline_mode<synchronous>, transform_indices = @transform_4, window_bounds = array<i64: 32, 64>}, {pipeline_mode = #tpu.pipeline_mode<synchronous>, transform_indices = @transform_5, window_bounds = array<i64: 16, 32>}, {pipeline_mode = #tpu.pipeline_mode<synchronous>, transform_indices = @transform_6, window_bounds = array<i64: 1, 16>}, {pipeline_mode = #tpu.pipeline_mode<synchronous>, transform_indices = @transform_7, window_bounds = array<i64: 64, 1>}, {pipeline_mode = #tpu.pipeline_mode<synchronous>, transform_indices = @transform_8, window_bounds = array<i64: 32, 1>}, {pipeline_mode = #tpu.pipeline_mode<synchronous>, transform_indices = @transform_9, window_bounds = array<i64: 16, 1>}, {pipeline_mode = #tpu.pipeline_mode<synchronous>, transform_indices = @transform_10, window_bounds = array<i64: 1, 1>}, {transform_indices = @transform_11, window_bounds = array<i64: 1, 128>}]} {
    %c0 = arith.constant 0 : index
    %c0_0 = arith.constant 0 : index
    %0 = vector.load %arg1[%c0, %c0_0] : memref<32x128xbf16, #tpu.memory_space<vmem>>, vector<32x128xbf16>
    %c0_1 = arith.constant 0 : index
    %c0_2 = arith.constant 0 : index
    %1 = vector.load %arg2[%c0_1, %c0_2] : memref<32x128xbf16, #tpu.memory_space<vmem>>, vector<32x128xbf16>
    %c0_3 = arith.constant 0 : index
    %c0_4 = arith.constant 0 : index
    %2 = vector.load %arg3[%c0_3, %c0_4] : memref<64x32xbf16, #tpu.memory_space<vmem>>, vector<64x32xbf16>
    %cst = arith.constant dense<0.000000e+00> : vector<64x128xf32>
    %3 = tpu.matmul %2, %0, %cst {dimension_numbers = #tpu.dot_dimension_numbers<[1], [0], [0], [1], [0, 0, 1, 1], [], []>} : vector<64x32xbf16>, vector<32x128xbf16>, vector<64x128xf32> -> vector<64x128xf32>
    %c0_5 = arith.constant 0 : index
    %c0_6 = arith.constant 0 : index
    %4 = vector.load %arg4[%c0_5, %c0_6] : memref<64x32xbf16, #tpu.memory_space<vmem>>, vector<64x32xbf16>
    %cst_7 = arith.constant dense<0.000000e+00> : vector<64x128xf32>
    %5 = tpu.matmul %4, %1, %cst_7 {dimension_numbers = #tpu.dot_dimension_numbers<[1], [0], [0], [1], [0, 0, 1, 1], [], []>} : vector<64x32xbf16>, vector<32x128xbf16>, vector<64x128xf32> -> vector<64x128xf32>
    %6 = arith.addf %3, %5 : vector<64x128xf32>
    %c0_8 = arith.constant 0 : index
    %c0_9 = arith.constant 0 : index
    %7 = vector.load %arg8[%c0_8, %c0_9] : memref<64x1xf32, #tpu.memory_space<vmem>>, vector<64x1xf32>
    %8 = vector.broadcast %7 : vector<64x1xf32> to vector<64x128xf32>
    %9 = arith.addf %6, %8 : vector<64x128xf32>
    %cst_10 = arith.constant 0.000000e+00 : f32
    %10 = vector.broadcast %cst_10 : f32 to vector<64x128xf32>
    %11 = arith.maximumf %9, %10 : vector<64x128xf32>
    %12 = arith.truncf %11 : vector<64x128xf32> to vector<64x128xbf16>
    %c0_11 = arith.constant 0 : index
    %c0_12 = arith.constant 0 : index
    %13 = vector.load %arg5[%c0_11, %c0_12] : memref<32x64xbf16, #tpu.memory_space<vmem>>, vector<32x64xbf16>
    %cst_13 = arith.constant dense<0.000000e+00> : vector<32x128xf32>
    %14 = tpu.matmul %13, %12, %cst_13 {dimension_numbers = #tpu.dot_dimension_numbers<[1], [0], [0], [1], [0, 0, 1, 1], [], []>} : vector<32x64xbf16>, vector<64x128xbf16>, vector<32x128xf32> -> vector<32x128xf32>
    %c0_14 = arith.constant 0 : index
    %c0_15 = arith.constant 0 : index
    %15 = vector.load %arg9[%c0_14, %c0_15] : memref<32x1xf32, #tpu.memory_space<vmem>>, vector<32x1xf32>
    %16 = vector.broadcast %15 : vector<32x1xf32> to vector<32x128xf32>
    %17 = arith.addf %14, %16 : vector<32x128xf32>
    %cst_16 = arith.constant 0.000000e+00 : f32
    %18 = vector.broadcast %cst_16 : f32 to vector<32x128xf32>
    %19 = arith.maximumf %17, %18 : vector<32x128xf32>
    %20 = arith.truncf %19 : vector<32x128xf32> to vector<32x128xbf16>
    %c0_17 = arith.constant 0 : index
    %c0_18 = arith.constant 0 : index
    %21 = vector.load %arg6[%c0_17, %c0_18] : memref<16x32xbf16, #tpu.memory_space<vmem>>, vector<16x32xbf16>
    %cst_19 = arith.constant dense<0.000000e+00> : vector<16x128xf32>
    %22 = tpu.matmul %21, %20, %cst_19 {dimension_numbers = #tpu.dot_dimension_numbers<[1], [0], [0], [1], [0, 0, 1, 1], [], []>} : vector<16x32xbf16>, vector<32x128xbf16>, vector<16x128xf32> -> vector<16x128xf32>
    %c0_20 = arith.constant 0 : index
    %c0_21 = arith.constant 0 : index
    %23 = vector.load %arg10[%c0_20, %c0_21] : memref<16x1xf32, #tpu.memory_space<vmem>>, vector<16x1xf32>
    %24 = vector.broadcast %23 : vector<16x1xf32> to vector<16x128xf32>
    %25 = arith.addf %22, %24 : vector<16x128xf32>
    %cst_22 = arith.constant 0.000000e+00 : f32
    %26 = vector.broadcast %cst_22 : f32 to vector<16x128xf32>
    %27 = arith.maximumf %25, %26 : vector<16x128xf32>
    %28 = arith.truncf %27 : vector<16x128xf32> to vector<16x128xbf16>
    %c0_23 = arith.constant 0 : index
    %c0_24 = arith.constant 0 : index
    %29 = vector.load %arg7[%c0_23, %c0_24] : memref<1x16xbf16, #tpu.memory_space<vmem>>, vector<1x16xbf16>
    %cst_25 = arith.constant dense<0.000000e+00> : vector<1x128xf32>
    %30 = tpu.matmul %29, %28, %cst_25 {dimension_numbers = #tpu.dot_dimension_numbers<[1], [0], [0], [1], [0, 0, 1, 1], [], []>} : vector<1x16xbf16>, vector<16x128xbf16>, vector<1x128xf32> -> vector<1x128xf32>
    %c0_26 = arith.constant 0 : index
    %c0_27 = arith.constant 0 : index
    %31 = vector.load %arg11[%c0_26, %c0_27] : memref<1x1xf32, #tpu.memory_space<vmem>>, vector<1x1xf32>
    %32 = vector.broadcast %31 : vector<1x1xf32> to vector<1x128xf32>
    %33 = arith.addf %30, %32 : vector<1x128xf32>
    %c0_28 = arith.constant 0 : index
    %c0_29 = arith.constant 0 : index
    %34 = vector.load %arg12[%c0_28, %c0_29] : memref<1x128xf32, #tpu.memory_space<vmem>>, vector<1x128xf32>
    tpu.vector_store %arg12[%c0_28, %c0_29], %33 {strides = array<i32>} : memref<1x128xf32, #tpu.memory_space<vmem>>, vector<1x128xf32>,
    return
  }
  func.func @transform_0(%arg0: i32) -> (i32, i32) {
    %c0_i32 = arith.constant 0 : i32
    %c0_i32_0 = arith.constant 0 : i32
    return %c0_i32, %arg0 : i32, i32
  }
  func.func @transform_1(%arg0: i32) -> (i32, i32) {
    %c0_i32 = arith.constant 0 : i32
    %c0_i32_0 = arith.constant 0 : i32
    return %c0_i32, %arg0 : i32, i32
  }
  func.func @transform_2(%arg0: i32) -> (i32, i32) {
    %c0_i32 = arith.constant 0 : i32
    %c0_i32_0 = arith.constant 0 : i32
    %c0_i32_1 = arith.constant 0 : i32
    return %c0_i32, %c0_i32_0 : i32, i32
  }
  func.func @transform_3(%arg0: i32) -> (i32, i32) {
    %c0_i32 = arith.constant 0 : i32
    %c0_i32_0 = arith.constant 0 : i32
    %c0_i32_1 = arith.constant 0 : i32
    return %c0_i32, %c0_i32_0 : i32, i32
  }
  func.func @transform_4(%arg0: i32) -> (i32, i32) {
    %c0_i32 = arith.constant 0 : i32
    %c0_i32_0 = arith.constant 0 : i32
    %c0_i32_1 = arith.constant 0 : i32
    return %c0_i32, %c0_i32_0 : i32, i32
  }
  func.func @transform_5(%arg0: i32) -> (i32, i32) {
    %c0_i32 = arith.constant 0 : i32
    %c0_i32_0 = arith.constant 0 : i32
    %c0_i32_1 = arith.constant 0 : i32
    return %c0_i32, %c0_i32_0 : i32, i32
  }
  func.func @transform_6(%arg0: i32) -> (i32, i32) {
    %c0_i32 = arith.constant 0 : i32
    %c0_i32_0 = arith.constant 0 : i32
    %c0_i32_1 = arith.constant 0 : i32
    return %c0_i32, %c0_i32_0 : i32, i32
  }
  func.func @transform_7(%arg0: i32) -> (i32, i32) {
    %c0_i32 = arith.constant 0 : i32
    %c0_i32_0 = arith.constant 0 : i32
    %c0_i32_1 = arith.constant 0 : i32
    return %c0_i32, %c0_i32_0 : i32, i32
  }
  func.func @transform_8(%arg0: i32) -> (i32, i32) {
    %c0_i32 = arith.constant 0 : i32
    %c0_i32_0 = arith.constant 0 : i32
    %c0_i32_1 = arith.constant 0 : i32
    return %c0_i32, %c0_i32_0 : i32, i32
  }
  func.func @transform_9(%arg0: i32) -> (i32, i32) {
    %c0_i32 = arith.constant 0 : i32
    %c0_i32_0 = arith.constant 0 : i32
    %c0_i32_1 = arith.constant 0 : i32
    return %c0_i32, %c0_i32_0 : i32, i32
  }
  func.func @transform_10(%arg0: i32) -> (i32, i32) {
    %c0_i32 = arith.constant 0 : i32
    %c0_i32_0 = arith.constant 0 : i32
    %c0_i32_1 = arith.constant 0 : i32
    return %c0_i32, %c0_i32_0 : i32, i32
  }
  func.func @transform_11(%arg0: i32) -> (i32, i32) {
    %c0_i32 = arith.constant 0 : i32
    %c0_i32_0 = arith.constant 0 : i32
    return %c0_i32, %arg0 : i32, i32
  }
}

</mosaic_0001>

<bundles_post_ra>
// kernel: tpu_custom_call.1
= control target key start
LH: loop header
LB: loop body
LE: loop exit
PB: predicated region body
PF: predicated region fallthrough
CT: control target
= control target key end

     0   :  { %s924_s0 = inlined_call_operand.vmem [shape: bf16[32,128], index: 0, kind: input, shape index: {}]   ;;  %s925_s1 = inlined_call_operand.vmem [shape: bf16[32,128], index: 1, kind: input, shape index: {}]   ;;  %s926_s2 = inlined_call_operand.vmem [shape: bf16[64,32], index: 2, kind: input, shape index: {}]   ;;  %s927_s3 = inlined_call_operand.vmem [shape: bf16[64,32], index: 3, kind: input, shape index: {}]   ;;  %s928_s4 = inlined_call_operand.vmem [shape: bf16[32,64], index: 4, kind: input, shape index: {}]   ;;  %s929_s5 = inlined_call_operand.vmem [shape: bf16[16,32], index: 5, kind: input, shape index: {}]   ;;  %s930_s6 = inlined_call_operand.vmem [shape: bf16[1,16], index: 6, kind: input, shape index: {}]   ;;  %s931_s7 = inlined_call_operand.vmem [shape: f32[64,1], index: 7, kind: input, shape index: {}]   ;;  %s932_s8 = inlined_call_operand.vmem [shape: f32[32,1], index: 8, kind: input, shape index: {}]   ;;  %s933_s9 = inlined_call_operand.vmem [shape: f32[16,1], index: 9, kind: input, shape index: {}]   ;;  %s934_s10 = inlined_call_operand.<no memory space> [shape: f32[1,1], index: 10, kind: input, shape index: {}]   ;;  %s935_s11 = inlined_call_operand.hbm [shape: f32[1,128], index: 11, kind: output, shape index: {}]  }
   0x1   :  { %v16_v0 = vstv %s934_s10 }
   0x2   :  { %17 = vst [vmem:[#allocation2] sm:$0x1] %v16_v0 }
   0x3   :  { %v703_v1 = vld [vmem:[%s925_s1] sm:$0xff]   ;;  %vm98_vm0 = vcmask 261120   ;;  %v704_v2 = vld [vmem:[%s925_s1 + $0x8] sm:$0xff]   ;;  %v742_v4 = vmov 0   ;;  %v708_v7 = vld [vmem:[%s927_s3 + $0x10] sm:$0xff]  }
   0x4   :  { %639 = vmatprep.subr.bf16.mxu0 %v703_v1  ;;  %v705_v3 = vld [vmem:[%s927_s3] sm:$0xff]   ;;  %701 = vset.pattern.permute.xlu0 %v742_v4  ;;  %v706_v6 = vld [vmem:[%s927_s3 + $0x8] sm:$0xff]   ;;  %v287_v10 = vld [vmem:[%s931_s7 + $0x10] sm:$0xff] }
   0x5   :  { %640 = vmatpush3.bf16.msra.mxu0 %v703_v1  ;;  %702 = vset.pattern.permute.xlu1 %v742_v4  ;;  %v707_v5 = vld [vmem:[%s924_s0] sm:$0xff]   ;;  %v710_v8 = vld [vmem:[%s924_s0 + $0x8] sm:$0xff]   ;;  %v709_v11 = vld [vmem:[%s927_s3 + $0x18] sm:$0xff]  }
   0x6   :  { %641 = vmatprep.subr.bf16.mxu0 %v704_v2  ;;  %643 = vmatprep.mubr.msk.bf16.mxu0 %vm98_vm0, %v705_v3  ;;  %v285_v9 = vld [vmem:[%s931_s7] sm:$0xff]  ;;  %v286_v12 = vld [vmem:[%s931_s7 + $0x8] sm:$0xff]  ;;  %v288_v13 = vld [vmem:[%s931_s7 + $0x18] sm:$0xff] }
   0x7   :  { %295 = vperm.xlu0 %701, %v285_v9   ;;  %305 = vperm.xlu1 %702, %v287_v10   ;;  %v711_v14 = vld [vmem:[%s926_s2] sm:$0xff]   ;;  %v290_v16 = vld [vmem:[%s931_s7 + $0x28] sm:$0xff] }
   0x8   :  { %v289_v15 = vld [vmem:[%s931_s7 + $0x20] sm:$0xff] }
   0x9   :  { %642 = vmatpush3.bf16.msra.mxu0 %v704_v2 }
   0xa   :  { %651 = vmatprep.subr.bf16.mxu0 %v707_v5 }
   0xb   :  { %300 = vperm.xlu0 %701, %v286_v12   ;;  %310 = vperm.xlu1 %702, %v288_v13  }
   0xc   :  { %644 = vmatmul.mubr.msk.bf16.vlgmr.msra.gmra.mrb[0].mxu0 %vm98_vm0, %v706_v6 }
   0xd   :  { %652 = vmatpush3.bf16.msra.mxu0 %v707_v5  ;;  %647 = vmatprep.mubr.msk.bf16.mxu0 %vm98_vm0, %v708_v7 }
   0xe   :  { %653 = vmatprep.subr.bf16.mxu0 %v710_v8 }
  0x11   :  { %654 = vmatpush3.bf16.msra.mxu0 %v710_v8 }
  0x14   :  { %648 = vmatmul.mubr.msk.bf16.gmra.mrb[4].mxu0 %vm98_vm0, %v709_v11 }
  0x15   :  { %655 = vmatprep.mubr.msk.bf16.mxu0 %vm98_vm0, %v711_v14 }
  0x16   :  { %18 = vsyncpa [#allocation4], 0  ;;  %315 = vperm.xlu0 %701, %v289_v15   ;;  %320 = vperm.xlu1 %702, %v290_v16   ;;  %v712_v17 = vld [vmem:[%s926_s2 + $0x8] sm:$0xff]   ;;  %v291_v18 = vld [vmem:[%s931_s7 + $0x30] sm:$0xff]  ;;  %vm391_vm1 = vcmask 523264   ;;  %v743_v3 = vmov 0.0  }
  0x17   :  { %v292_v19 = vld [vmem:[%s931_s7 + $0x38] sm:$0xff]  ;;  %v713_v20 = vld [vmem:[%s926_s2 + $0x10] sm:$0xff]   ;;  %v357_v21 = vld [vmem:[%s932_s8] sm:$0xff]  ;;  %vm744_vm2 = vmmov 0   ;;  %vm530_vm3 = vcmask 130048   ;;  %s745_s26 = smov [#allocation3]  }
  0x18   :  { %v358_v22 = vld [vmem:[%s932_s8 + $0x8] sm:$0xff]  ;;  %v714_v23 = vld [vmem:[%s926_s2 + $0x18] sm:$0xff]   ;;  %v359_v24 = vld [vmem:[%s932_s8 + $0x10] sm:$0xff]  ;;  %s581_s27 = sshll.u32 %s745_s26, 4  ;;  %s582_s27 = int_to_ptr.vmem [resolvable:$true] %s581_s27 }
  0x19   :  { %v360_v25 = vld [vmem:[%s932_s8 + $0x18] sm:$0xff]  ;;  %v455_v26 = vld [vmem:[%s933_s9] sm:$0xff]  ;;  %v456_v27 = vld [vmem:[%s933_s9 + $0x8] sm:$0xff]  ;;  %s718_s1 = scalar_lea.vmem %s582_s27, 16  ;;  %s722_s28 = scalar_lea.vmem %s582_s27, 32 }
  0x1a   :  { %325 = vperm.xlu0 %701, %v291_v18   ;;  %330 = vperm.xlu1 %702, %v292_v19   ;;  %v520_v28 = vld [vmem:[#allocation2] sm:$0x1]  ;;  %v716_v2 = vld [vmem:[%s928_s4 + $0x8] sm:$0xff]   ;;  %p719_p0 = scmp.ne.s32.totalorder %s582_s27, %s718_s1  ;;  %p723_p1 = scmp.lt.s32.totalorder %s582_s27, %s582_s27 }
  0x1b   :  { %v715_v29 = vld [vmem:[%s928_s4] sm:$0xff]   ;;  %p724_p2 = scmp.lt.s32.totalorder %s722_s28, %s718_s1 }
  0x1c   :  { %656 = vmatmul.mubr.msk.bf16.vlgmr.msra.gmra.mrb[0].mxu0 %vm98_vm0, %v712_v17  ;;  %671 = vmatprep.mubr.msk.bf16.mxu1 %vm391_vm1, %v715_v29 }
  0x1d   :  { %659 = vmatprep.mubr.msk.bf16.mxu0 %vm98_vm0, %v713_v20  ;;  %p725_p3 = por %p724_p2, %p723_p1 }
  0x1e   :  { %363 = vperm.xlu0 %701, %v357_v21   ;;  %368 = vperm.xlu1 %702, %v358_v22   ;;  %v717_v22 = vld [vmem:[%s929_s5] sm:$0xff]  }
  0x1f   :  { %p726_p4 = pnand %p725_p3, %p719_p0 }
  0x22   :  { %373 = vperm.xlu0 %701, %v359_v24   ;;  %378 = vperm.xlu1 %702, %v360_v25  }
  0x24   :  { %660 = vmatmul.mubr.msk.bf16.gmra.mrb[4].mxu0 %vm98_vm0, %v714_v23 }
  0x26   :  { %459 = vperm.xlu0 %701, %v455_v26   ;;  %464 = vperm.xlu1 %702, %v456_v27  }
  0x2a   :  { %523 = vperm.xlu0 %701, %v520_v28  }
  0x86   :  { %v296_v30 = vpop.permute.xlu0 %295  ;;  %v306_v31 = vpop.permute.xlu1 %305 }
  0x8a   :  { %v301_v32 = vpop.permute.xlu0 %300  ;;  %v311_v33 = vpop.permute.xlu1 %310 }
  0x95   :  { %v316_v37 = vpop.permute.xlu0 %315  ;;  %v321_v42 = vpop.permute.xlu1 %320 }
  0x99   :  { %v326_v49 = vpop.permute.xlu0 %325  ;;  %v331_v54 = vpop.permute.xlu1 %330 }
  0x9d   :  { %v364_v4 = vpop.permute.xlu0 %363  ;;  %v369_v5 = vpop.permute.xlu1 %368 }
  0xa1   :  { %v374_v6 = vpop.permute.xlu0 %373  ;;  %v379_v10 = vpop.permute.xlu1 %378 }
  0xa5   :  { %v460_v23 = vpop.permute.xlu0 %459  ;;  %v465_v27 = vpop.permute.xlu1 %464 }
  0xef   :  { %v657_v34 = vpop.f32.mrb[0].mxu0 }
  0xf0   :  { %v335_v35 = vadd.f32 %v657_v34, %v306_v31  ;;  %v254_v36 = vpop.f32.mrb[1].mxu0  ;;  %v519_v34 = vld [vmem:[%s930_s6] sm:$0x1] }
  0xf1   :  { %v333_v38 = vadd.f32 %v296_v30, %v254_v36  ;;  %v658_v39 = vpop.f32.mrb[2].mxu0 }
  0xf2   :  { %v336_v40 = vadd.f32 %v658_v39, %v311_v33  ;;  %v257_v41 = vpop.f32.mrb[3].mxu0  ;;  %v343_v44 = vmax.f32 %v335_v35, 0.0  ;;  %v526_v35 = vlaneseq }
  0xf3   :  { %v334_v43 = vadd.f32 %v301_v32, %v257_v41  ;;  %v341_v46 = vmax.f32 %v333_v38, 0.0  ;;  %v524_v38 = vpop.permute.xlu0 %523 }
  0xf4   :  { %v344_v45 = vmax.f32 %v336_v40, 0.0  ;;  %v527_v36 = vshrl.u32 %v526_v35, 7 }
  0xf5   :  { %v342_v47 = vmax.f32 %v334_v43, 0.0 }
  0xf6   :  { %v350_v48 = vpack.c.bf16 %v344_v45, %v343_v44 }
  0xf7   :  { %v661_v50 = vpop.f32.mrb[4].mxu0  ;;  %v349_v51 = vpack.c.bf16 %v342_v47, %v341_v46 }
  0xf8   :  { %v339_v52 = vadd.f32 %v661_v50, %v326_v49  ;;  %v270_v53 = vpop.f32.mrb[5].mxu0 }
  0xf9   :  { %v337_v55 = vadd.f32 %v316_v37, %v270_v53  ;;  %v662_v56 = vpop.f32.mrb[6].mxu0  ;;  %663 = vmatprep.subr.bf16.mxu1 %v349_v51  ;;  %v528_v37 = vsub.s32 0, %v527_v36 }
  0xfa   :  { %v340_v57 = vadd.f32 %v662_v56, %v331_v54  ;;  %v273_v58 = vpop.f32.mrb[7].mxu0  ;;  %664 = vmatpush3.bf16.msra.mxu1 %v349_v51  ;;  %v347_v60 = vmax.f32 %v339_v52, 0.0 }
  0xfb   :  { %v338_v59 = vadd.f32 %v321_v42, %v273_v58  ;;  %665 = vmatprep.subr.bf16.mxu1 %v350_v48  ;;  %v345_v62 = vmax.f32 %v337_v55, 0.0  ;;  %v529_v39 = vrot.slane %v524_v38, %v528_v37 }
  0xfc   :  { %v348_v61 = vmax.f32 %v340_v57, 0.0 }
  0xfd   :  { %v346_v63 = vmax.f32 %v338_v59, 0.0 }
  0xfe   :  { %v352_v0 = vpack.c.bf16 %v348_v61, %v347_v60  ;;  %666 = vmatpush3.bf16.msra.mxu1 %v350_v48 }
  0xff   :  { %v351_v1 = vpack.c.bf16 %v346_v63, %v345_v62 }
 0x101   :  { %667 = vmatprep.subr.bf16.mxu1 %v351_v1 }
 0x102   :  { %668 = vmatpush3.bf16.msra.mxu1 %v351_v1 }
 0x103   :  { %669 = vmatprep.subr.bf16.mxu1 %v352_v0 }
 0x106   :  { %670 = vmatpush3.bf16.msra.mxu1 %v352_v0 }
 0x107   :  { %675 = vmatprep.subr.bf16.mxu1 %v743_v3 }
 0x109   :  { %672 = vmatmul.mubr.msk.bf16.vlgmr.msra.gmra.mrb[0].mxu1 %vm391_vm1, %v716_v2 }
 0x10a   :  { %679 = vmatprep.mubr.msk.bf16.mxu1 %vm744_vm2, %v743_v3 }
 0x1dc   :  { %v673_v7 = vpop.f32.mrb[0].mxu1 }
 0x1dd   :  { %v441_v8 = vadd.f32 %v673_v7, %v374_v6  ;;  %v432_v9 = vpop.f32.mrb[1].mxu1 }
 0x1de   :  { %v433_v11 = vadd.f32 %v432_v9, %v364_v4  ;;  %v674_v12 = vpop.f32.mrb[2].mxu1 }
 0x1df   :  { %v444_v13 = vadd.f32 %v674_v12, %v379_v10  ;;  %v435_v14 = vpop.f32.mrb[3].mxu1  ;;  %v449_v16 = vmax.f32 %v441_v8, 0.0 }
 0x1e0   :  { %v436_v15 = vadd.f32 %v435_v14, %v369_v5  ;;  %v447_v18 = vmax.f32 %v433_v11, 0.0 }
 0x1e1   :  { %v450_v17 = vmax.f32 %v444_v13, 0.0 }
 0x1e2   :  { %v448_v19 = vmax.f32 %v436_v15, 0.0 }
 0x1e3   :  { %v452_v20 = vpack.c.bf16 %v450_v17, %v449_v16 }
 0x1e4   :  { %v451_v21 = vpack.c.bf16 %v448_v19, %v447_v18 }
 0x1e6   :  { %676 = vmatpush3.bf16.msra.mxu1 %v451_v21 }
 0x1e7   :  { %677 = vmatprep.subr.bf16.mxu1 %v743_v3 }
 0x1ea   :  { %678 = vmatpush3.bf16.msra.mxu1 %v452_v20 }
 0x1eb   :  { %683 = vmatprep.subr.bf16.mxu1 %v743_v3 }
 0x1ed   :  { %680 = vmatmul.mubr.msk.bf16.vlgmr.msra.gmra.mrb[4].mxu1 %vm98_vm0, %v717_v22 }
 0x1ee   :  { %685 = vmatprep.mubr.msk.bf16.mxu1 %vm744_vm2, %v743_v3 }
 0x2c0   :  { %v509_v24 = vpop.f32.mrb[4].mxu1 }
 0x2c1   :  { %v510_v25 = vadd.f32 %v509_v24, %v460_v23  ;;  %v681_v26 = vpop.f32.mrb[5].mxu1 }
 0x2c2   :  { %v512_v28 = vpop.f32.mrb[6].mxu1 }
 0x2c3   :  { %v513_v29 = vadd.f32 %v512_v28, %v465_v27  ;;  %v682_v30 = vpop.f32.mrb[7].mxu1  ;;  %v516_v31 = vmax.f32 %v510_v25, 0.0 }
 0x2c5   :  { %v517_v32 = vmax.f32 %v513_v29, 0.0 }
 0x2c7   :  { %v518_v33 = vpack.c.bf16 %v517_v32, %v516_v31 }
 0x2c9   :  { %684 = vmatpush3.bf16.msra.mxu1 %v518_v33 }
 0x2cc   :  { %686 = vmatmul.mubr.msk.bf16.vlgmr.msra.gmra.mrb[8].mxu1 %vm530_vm3, %v519_v34 }
 0x39f   :  { %v568_v40 = vpop.f32.mrb[8].mxu1 }
 0x3a0   :  { %v569_v41 = vadd.f32 %v568_v40, %v529_v39  ;;  %v687_v42 = vpop.f32.mrb[9].mxu1 }
 0x3a1   :  { %v571_v43 = vpop.f32.mrb[10].mxu1 }
 0x3a2   :  { %574 = vst [vmem:[#allocation3] sm:$0x1] %v569_v41  ;;  %v688_v44 = vpop.f32.mrb[11].mxu1 }
 0x3a3   :  { %729 = shalt.err (!%p726_p4)
}
 0x3a4   :  { %s730_s30 = scalar_lea.hbm %s935_s11, 16 }
 0x3a5   :  { %p731_p5 = scmp.ne.s32.totalorder %s935_s11, %s730_s30  ;;  %p734_p6 = scmp.lt.u32.totalorder %s730_s30, %s935_s11 }
 0x3a7   :  { %p736_p7 = pnand %p734_p6, %p731_p5 }
 0x3a9   :  { %739 = shalt.err (!%p736_p7)
}
 0x3aa   :  { %584 = dma.vmem_to_hbm [thread:$0]  %s582_s27, 16, %s935_s11, [#allocation4]  }
 0x3ab   :  { %740 = dma.done.wait [#allocation4], 16  }
 0x3ac   :  { %741 = vsyncadd [#allocation4], 4294967280 }
 0x3ad   :  { %588 = vsyncpa [#allocation4], 1 }

</bundles_post_ra>
